<compile_context>
chip_gen: v7x
topology: tpu7x:2x2x1
jax: 0.10.0
libtpu: 0.0.40
codegen_flags: <defaults>
</compile_context>

<pallas_src>
import functools

import numpy as np
import jax
import jax.numpy as jnp
from jax import lax
from jax.experimental import pallas as pl
from jax.experimental.pallas import tpu as pltpu


def _pick_tile(hw, requested):
    """Pick a lane-tile size: multiple of 128 (or the full HW extent)."""
    if hw % 128 == 0:
        t = (min(requested, hw) // 128) * 128
        return max(t, 128)
    # HW not 128-aligned: block must equal the full dim.
    return hw


def _pass1_kernel(x_ref, t_ref, *rest, hw, tile, has_w, ragged):
    """softmax over C sublanes + row-aligned (NHWC-order) selections.

    x_ref : (1, C, T) logits (native dtype), classes on sublanes, pixels on lanes
    t_ref : (1, 1, T) int32 targets
    [w_ref: (1, 1, T) f32 per-pixel weights]      (only if has_w)
    cw_ref: (C, 1)    f32 normalized class weights
    p_ref : (1, C, T) f32 softmax output (NCHW layout)
    g_ref : (1, 1, T) f32 per-pixel partial  -cw[t] * log_p[t] * w
    """
    if has_w:
        w_ref, cw_ref, p_ref, g_ref = rest
    else:
        cw_ref, p_ref, g_ref = rest

    x = x_ref[0].astype(jnp.float32)                    # (C, T)
    c, t_lanes = x.shape

    m = jnp.max(x, axis=0, keepdims=True)               # (1, T)
    e = jnp.exp(x - m)
    s = jnp.sum(e, axis=0, keepdims=True)               # (1, T)
    p = e / s                                           # (C, T)
    p_ref[0] = p

    lp = (x - m) - jnp.log(s)                           # (C, T) log_softmax

    tgt = t_ref[0]                                      # (1, T) int32
    cls = lax.broadcasted_iota(jnp.int32, (c, t_lanes), 0)
    onehot = (cls == tgt).astype(jnp.float32)           # (C, T)

    lp_sel = jnp.sum(onehot * lp, axis=0, keepdims=True)            # (1, T)
    cw_sel = jnp.sum(onehot * cw_ref[...], axis=0, keepdims=True)   # (1, T)

    g = -cw_sel * lp_sel
    if has_w:
        g = g * w_ref[0].astype(jnp.float32)

    if ragged:
        col = pl.program_id(1) * tile + lax.broadcasted_iota(
            jnp.int32, (1, t_lanes), 1)
        g = jnp.where(col < hw, g, 0.0)

    g_ref[0] = g


def _pass2_kernel(ps_ref, t_ref, g_ref, out_ref, *, gamma, hw, tile, ragged):
    """Scrambled p selection + focal weighting + per-tile partial sum.

    ps_ref : (1, C, T) f32  scrambled-transposed p (classes on sublanes,
                            scrambled rows == pixels on lanes)
    t_ref  : (1, 1, T) int32 targets
    g_ref  : (1, 1, T) f32   per-pixel partial from pass 1
    out_ref: (1, 1, 1, 128) f32 per-tile partial sum (broadcast across lanes)
    """
    ps = ps_ref[0]                                      # (C, T)
    tgt = t_ref[0]                                      # (1, T)
    g = g_ref[0]                                        # (1, T)
    c, t_lanes = ps.shape

    cls = lax.broadcasted_iota(jnp.int32, (c, t_lanes), 0)
    onehot = (cls == tgt).astype(jnp.float32)           # (C, T)

    p_sel = jnp.sum(onehot * ps, axis=0, keepdims=True)  # (1, T)
    om = jnp.maximum(1.0 - p_sel, 0.0)

    if float(gamma).is_integer() and gamma >= 0:
        focal = lax.integer_pow(om, int(gamma))
    else:
        focal = jnp.exp(gamma * jnp.log(jnp.maximum(om, 1e-30)))

    contrib = g * focal                                  # (1, T)
    if ragged:
        col = pl.program_id(1) * tile + lax.broadcasted_iota(
            jnp.int32, (1, t_lanes), 1)
        contrib = jnp.where(col < hw, contrib, 0.0)

    out_ref[...] = jnp.full((1, 1, 1, 128), jnp.sum(contrib), jnp.float32)


def focal_loss(logits, target, gamma=2.0, alpha=None, w=None, tile_hw=4096):
    """Pallas implementation of FocalLoss.forward (w optional, mean reduction)."""
    B, C, H, W = logits.shape
    HW = H * W
    N = B * HW

    if alpha is None:
        cw = jnp.ones((C, 1), jnp.float32)
    else:
        a = jnp.asarray(alpha, jnp.float32).reshape(C)
        cw = (a / jnp.sum(a)).reshape(C, 1)

    T = _pick_tile(HW, tile_hw)
    G = -(-HW // T)
    ragged = (G * T != HW)

    # Layout plumbing only (reshapes are free; logits keep their native dtype).
    x3 = logits.reshape(B, C, HW)
    t3 = target.reshape(B, 1, HW).astype(jnp.int32)
    has_w = w is not None

    in_arrays = [x3, t3]
    in_specs = [pl.BlockSpec((1, C, T), lambda b, i: (b, 0, i)),
                pl.BlockSpec((1, 1, T), lambda b, i: (b, 0, i))]
    if has_w:
        w3 = w.reshape(B, 1, HW).astype(jnp.float32)
        in_arrays.append(w3)
        in_specs.append(pl.BlockSpec((1, 1, T), lambda b, i: (b, 0, i)))
    in_arrays.append(cw)
    in_specs.append(pl.BlockSpec((C, 1), lambda b, i: (0, 0)))

    kernel1 = functools.partial(_pass1_kernel, hw=HW, tile=T,
                                has_w=has_w, ragged=ragged)
    p_nat, g = pl.pallas_call(
        kernel1,
        out_shape=(jax.ShapeDtypeStruct((B, C, HW), jnp.float32),
                   jax.ShapeDtypeStruct((B, 1, HW), jnp.float32)),
        grid=(B, G),
        in_specs=in_specs,
        out_specs=(pl.BlockSpec((1, C, T), lambda b, i: (b, 0, i)),
                   pl.BlockSpec((1, 1, T), lambda b, i: (b, 0, i))),
        compiler_params=pltpu.CompilerParams(
            dimension_semantics=("parallel", "parallel")),
    )(*in_arrays)

    # Realize PyTorch's `p.view(-1, C)` scramble of the un-transposed NCHW
    # softmax as a lane-dense (classes-on-sublanes, rows-on-lanes) array.
    # reshape is free; the swapaxes is the single remaining relayout op.
    p_scr = jnp.swapaxes(p_nat.reshape(B, HW, C), 1, 2)   # (B, C, HW)

    kernel2 = functools.partial(_pass2_kernel, gamma=float(gamma), hw=HW,
                                tile=T, ragged=ragged)
    partial_sums = pl.pallas_call(
        kernel2,
        out_shape=jax.ShapeDtypeStruct((B, G, 1, 128), jnp.float32),
        grid=(B, G),
        in_specs=[pl.BlockSpec((1, C, T), lambda b, i: (b, 0, i)),
                  pl.BlockSpec((1, 1, T), lambda b, i: (b, 0, i)),
                  pl.BlockSpec((1, 1, T), lambda b, i: (b, 0, i))],
        out_specs=pl.BlockSpec((1, 1, 1, 128), lambda b, i: (b, i, 0, 0)),
        compiler_params=pltpu.CompilerParams(
            dimension_semantics=("parallel", "parallel")),
    )(p_scr, t3, g)

    # TODO(synk): PyTorch's `log_p[target >= 0]` boolean filter (data-dependent
    # size) is assumed a no-op (all targets valid); the mean divides by all N.
    return jnp.sum(partial_sums[:, :, 0, 0]) / jnp.float32(N)


def focal_loss_ref(logits, target, gamma=2.0, alpha=None, w=None):
    """Pure-JAX reference reproducing the PyTorch forward exactly."""
    B, C, H, W = logits.shape
    N = B * H * W
    logits = logits.astype(jnp.float32)
    lp = jax.nn.log_softmax(logits, axis=1)
    p = jax.nn.softmax(logits, axis=1)
    lp_rows = jnp.transpose(lp, (0, 2, 3, 1)).reshape(N, C)
    p_rows = p.reshape(N, C)                 # same (un-transposed) view as PyTorch
    t = target.reshape(N)
    if alpha is None:
        cw = jnp.ones((C,), jnp.float32)
    else:
        a = jnp.asarray(alpha, jnp.float32)
        cw = a / jnp.sum(a)
    idx = jnp.arange(N)
    loss = -cw[t] * (1.0 - p_rows[idx, t]) ** gamma * lp_rows[idx, t]
    if w is None:
        return loss.mean()
    return (loss * w.reshape(N)).mean()


if __name__ == "__main__":
    key = jax.random.PRNGKey(0)
    k1, k2, k3 = jax.random.split(key, 3)

    B, C, H, W = 2, 4, 16, 16
    logits = jax.random.normal(k1, (B, C, H, W), dtype=jnp.float32)
    target = jax.random.randint(k2, (B, H, W), 0, C, dtype=jnp.int32)
    wpix = jax.random.uniform(k3, (B, H, W), dtype=jnp.float32)

    gamma = 2.0
    alpha = np.array([1.0, 2.0, 3.0, 4.0], dtype=np.float32)

    # Case 1: class weights, no per-pixel weight.
    loss1 = jax.block_until_ready(
        focal_loss(logits, target, gamma=gamma, alpha=alpha, w=None))
    ref1 = jax.block_until_ready(
        focal_loss_ref(logits, target, gamma=gamma, alpha=alpha, w=None))
    np.testing.assert_allclose(float(loss1), float(ref1), rtol=1e-4, atol=1e-5)

    # Case 2: no class weights, per-pixel weight provided.
    loss2 = jax.block_until_ready(
        focal_loss(logits, target, gamma=gamma, alpha=None, w=wpix))
    ref2 = jax.block_until_ready(
        focal_loss_ref(logits, target, gamma=gamma, alpha=None, w=wpix))
    np.testing.assert_allclose(float(loss2), float(ref2), rtol=1e-4, atol=1e-5)

    print("KERNEL_OK")
</pallas_src>

<mosaic_0001>
module attributes {stable_mosaic.version = 11 : i64} {
  func.func @_pass1_kernel(%arg0: i32, %arg1: i32, %arg2: memref<1x4x256xf32, #tpu.memory_space<vmem>>, %arg3: memref<1x1x256xi32, #tpu.memory_space<vmem>>, %arg4: memref<4x1xf32, #tpu.memory_space<vmem>>, %arg5: memref<1x4x256xf32, #tpu.memory_space<vmem>>, %arg6: memref<1x1x256xf32, #tpu.memory_space<vmem>>) attributes {dimension_semantics = [#tpu.dimension_semantics<parallel>, #tpu.dimension_semantics<parallel>], iteration_bounds = array<i64: 2, 1>, scalar_prefetch = 0 : i64, scratch_operands = 0 : i64, tpu.core_type = #tpu.core_type<tc>, window_params = [{transform_indices = @transform_0, window_bounds = array<i64: 1, 4, 256>}, {transform_indices = @transform_1, window_bounds = array<i64: 1, 1, 256>}, {pipeline_mode = #tpu.pipeline_mode<synchronous>, transform_indices = @transform_2, window_bounds = array<i64: 4, 1>}, {transform_indices = @transform_3, window_bounds = array<i64: 1, 4, 256>}, {transform_indices = @transform_4, window_bounds = array<i64: 1, 1, 256>}]} {
    %c0 = arith.constant 0 : index
    %c0_0 = arith.constant 0 : index
    %c0_1 = arith.constant 0 : index
    %0 = vector.load %arg2[%c0, %c0_0, %c0_1] : memref<1x4x256xf32, #tpu.memory_space<vmem>>, vector<1x4x256xf32>
    %1 = vector.shape_cast %0 : vector<1x4x256xf32> to vector<4x256xf32>
    %cst = arith.constant dense<0xFF800000> : vector<256xf32>
    %2 = vector.multi_reduction <maximumf>, %1, %cst [0] : vector<4x256xf32> to vector<256xf32>
    %3 = vector.shape_cast %2 : vector<256xf32> to vector<1x256xf32>
    %4 = vector.broadcast %3 : vector<1x256xf32> to vector<4x256xf32>
    %5 = arith.subf %1, %4 : vector<4x256xf32>
    %6 = math.exp %5 : vector<4x256xf32>
    %cst_2 = arith.constant dense<0.000000e+00> : vector<256xf32>
    %7 = vector.multi_reduction <add>, %6, %cst_2 [0] : vector<4x256xf32> to vector<256xf32>
    %8 = vector.shape_cast %7 : vector<256xf32> to vector<1x256xf32>
    %9 = vector.broadcast %8 : vector<1x256xf32> to vector<4x256xf32>
    %10 = arith.divf %6, %9 : vector<4x256xf32>
    %c0_3 = arith.constant 0 : index
    %c0_4 = arith.constant 0 : index
    %c0_5 = arith.constant 0 : index
    %11 = vector.load %arg5[%c0_3, %c0_4, %c0_5] : memref<1x4x256xf32, #tpu.memory_space<vmem>>, vector<1x4x256xf32>
    %12 = vector.shape_cast %11 : vector<1x4x256xf32> to vector<4x256xf32>
    %13 = vector.shape_cast %10 : vector<4x256xf32> to vector<1x4x256xf32>
    tpu.vector_store %arg5[%c0_3, %c0_4, %c0_5], %13 {strides = array<i32>} : memref<1x4x256xf32, #tpu.memory_space<vmem>>, vector<1x4x256xf32>,
    %14 = vector.broadcast %3 : vector<1x256xf32> to vector<4x256xf32>
    %15 = arith.subf %1, %14 : vector<4x256xf32>
    %16 = math.log %8 : vector<1x256xf32>
    %17 = vector.broadcast %16 : vector<1x256xf32> to vector<4x256xf32>
    %18 = arith.subf %15, %17 : vector<4x256xf32>
    %c0_6 = arith.constant 0 : index
    %c0_7 = arith.constant 0 : index
    %c0_8 = arith.constant 0 : index
    %19 = vector.load %arg3[%c0_6, %c0_7, %c0_8] : memref<1x1x256xi32, #tpu.memory_space<vmem>>, vector<1x1x256xi32>
    %20 = vector.shape_cast %19 : vector<1x1x256xi32> to vector<1x256xi32>
    %21 = tpu.iota {dimensions = array<i32: 0>} : vector<4x256xi32>
    %22 = vector.broadcast %20 : vector<1x256xi32> to vector<4x256xi32>
    %23 = arith.cmpi eq, %21, %22 : vector<4x256xi32>
    %24 = arith.extui %23 : vector<4x256xi1> to vector<4x256xi32>
    %25 = arith.sitofp %24 : vector<4x256xi32> to vector<4x256xf32>
    %26 = arith.mulf %25, %18 : vector<4x256xf32>
    %cst_9 = arith.constant dense<0.000000e+00> : vector<256xf32>
    %27 = vector.multi_reduction <add>, %26, %cst_9 [0] : vector<4x256xf32> to vector<256xf32>
    %28 = vector.shape_cast %27 : vector<256xf32> to vector<1x256xf32>
    %c0_10 = arith.constant 0 : index
    %c0_11 = arith.constant 0 : index
    %29 = vector.load %arg4[%c0_10, %c0_11] : memref<4x1xf32, #tpu.memory_space<vmem>>, vector<4x1xf32>
    %30 = vector.broadcast %29 : vector<4x1xf32> to vector<4x256xf32>
    %31 = arith.mulf %25, %30 : vector<4x256xf32>
    %cst_12 = arith.constant dense<0.000000e+00> : vector<256xf32>
    %32 = vector.multi_reduction <add>, %31, %cst_12 [0] : vector<4x256xf32> to vector<256xf32>
    %33 = vector.shape_cast %32 : vector<256xf32> to vector<1x256xf32>
    %cst_13 = arith.constant 0.000000e+00 : f32
    %34 = vector.broadcast %cst_13 : f32 to vector<1x256xf32>
    %35 = arith.subf %34, %33 : vector<1x256xf32>
    %36 = arith.mulf %35, %28 : vector<1x256xf32>
    %c0_14 = arith.constant 0 : index
    %c0_15 = arith.constant 0 : index
    %c0_16 = arith.constant 0 : index
    %37 = vector.load %arg6[%c0_14, %c0_15, %c0_16] : memref<1x1x256xf32, #tpu.memory_space<vmem>>, vector<1x1x256xf32>
    %38 = vector.shape_cast %37 : vector<1x1x256xf32> to vector<1x256xf32>
    %39 = vector.shape_cast %36 : vector<1x256xf32> to vector<1x1x256xf32>
    tpu.vector_store %arg6[%c0_14, %c0_15, %c0_16], %39 {strides = array<i32>} : memref<1x1x256xf32, #tpu.memory_space<vmem>>, vector<1x1x256xf32>,
    return
  }
  func.func @transform_0(%arg0: i32, %arg1: i32) -> (i32, i32, i32) {
    %c0_i32 = arith.constant 0 : i32
    %c0_i32_0 = arith.constant 0 : i32
    return %arg0, %c0_i32, %arg1 : i32, i32, i32
  }
  func.func @transform_1(%arg0: i32, %arg1: i32) -> (i32, i32, i32) {
    %c0_i32 = arith.constant 0 : i32
    %c0_i32_0 = arith.constant 0 : i32
    return %arg0, %c0_i32, %arg1 : i32, i32, i32
  }
  func.func @transform_2(%arg0: i32, %arg1: i32) -> (i32, i32) {
    %c0_i32 = arith.constant 0 : i32
    %c0_i32_0 = arith.constant 0 : i32
    %c0_i32_1 = arith.constant 0 : i32
    return %c0_i32, %c0_i32_0 : i32, i32
  }
  func.func @transform_3(%arg0: i32, %arg1: i32) -> (i32, i32, i32) {
    %c0_i32 = arith.constant 0 : i32
    %c0_i32_0 = arith.constant 0 : i32
    return %arg0, %c0_i32, %arg1 : i32, i32, i32
  }
  func.func @transform_4(%arg0: i32, %arg1: i32) -> (i32, i32, i32) {
    %c0_i32 = arith.constant 0 : i32
    %c0_i32_0 = arith.constant 0 : i32
    return %arg0, %c0_i32, %arg1 : i32, i32, i32
  }
}

</mosaic_0001>

<bundles_post_ra>
// kernel: tpu_custom_call.1
= control target key start
LH: loop header
LB: loop body
LE: loop exit
PB: predicated region body
PF: predicated region fallthrough
CT: control target
= control target key end

     0   :  { %10 = vsyncpa [#allocation3], 0  ;;  %s1102_s0 = inlined_call_operand.hbm [shape: f32[2,4,256], index: 0, kind: input, shape index: {}]   ;;  %s1103_s1 = inlined_call_operand.vmem [shape: s32[2,1,256], index: 1, kind: input, shape index: {}]   ;;  %s1104_s2 = inlined_call_operand.vmem [shape: f32[4,1], index: 2, kind: input, shape index: {}]   ;;  %s1105_s3 = inlined_call_operand.hbm [shape: f32[2,4,256], index: 3, kind: output, shape index: {0}]   ;;  %s1106_s4 = inlined_call_operand.hbm [shape: f32[2,1,256], index: 4, kind: output, shape index: {1}]  }
   0x1   :  { %12 = vsyncpa [#allocation3 + $0x1], 0 }
   0x2   :  { %13 = vsyncpa [#allocation4], 0 }
   0x3   :  { %15 = vsyncpa [#allocation4 + $0x1], 0 }
   0x4   :  { %16 = vsyncpa [#allocation7], 0 }
   0x5   :  { %18 = vsyncpa [#allocation7 + $0x1], 0  ;;  %s879_s15 = smov 0   ;;  %s881_s16 = smov 0  }
   0x6   :  { %s883_s17 = smov 0   ;;  %s885_s18 = smov 0  }
   0x7   :  { %s887_s19 = smov 0   ;;  %s889_s20 = smov 0  }
   0x8 LB: > { %s597_s21 = sadd.s32 4294967295, %s846_s20   ;;  %s598_s22 = sadd.s32 4294967294, %s846_s20   ;;  %s846_s20 = sphi %s889_s20, %s24_s20   ;;  %s842_s19 = sphi %s887_s19, %s1122_s19   ;;  %s838_s18 = sphi %s885_s18, %s1121_s18   ;;  %s834_s17 = sphi %s883_s17, %s1120_s17   ;;  %s830_s16 = sphi %s881_s16, %s1119_s16   ;;  %s826_s15 = sphi %s879_s15, %s1118_s15  }
   0x9   : > { %s36_s23 = sadd.s32 1, %s842_s19  ;;  %s45_s24 = sadd.s32 1, %s834_s17 }
   0xa   : > { %p38_p0 = scmp.ge.s32.totalorder %s36_s23, 2  ;;  %p52_p1 = scmp.ne.s32.totalorder %s834_s17, %s830_s16 }
   0xb   : > { %p53_p2 = scmp.eq.s32.totalorder %s846_s20, 0  ;;  %p58_p3 = scmp.ne.s32.totalorder %s830_s16, %s826_s15 }
   0xc   : > { %s1124_s23 = smov (%p38_p0, %s36_s23), 0  ;;  %p59_p5 = scmp.eq.s32.totalorder %s597_s21, 0 }
   0xd   : > { %p920_p4 = por %p53_p2, %p52_p1  ;;  %s40_s26 = ssub.s32 %s842_s19, %s1124_s23 }
   0xe   : > { %p133_p6 = scmp.eq.s32.totalorder %s597_s21, 1  ;;  %p43_p7 = scmp.eq.s32.totalorder %s40_s26, 0 }
   0xf   : > { %p926_p8 = por %p59_p5, %p58_p3  ;;  %p139_p10 = scmp.eq.s32.totalorder %s598_s22, 1 }
  0x10   : > { %p930_p9 = por %p133_p6, %p52_p1  ;;  %p639_p13 = scmp.lt.s32.totalorder %s846_s20, 2 }
  0x11   : > { %s935_s29 = scalar_select %p43_p7, %s834_s17, %s45_s24  }
  0x12   : > { %s1110_s28 = scalar_select %p930_p9, 1, 0 }
  0x13   : > { %p937_p11 = por %p139_p10, %p58_p3  ;;  %s190_s5 = sand.u32 1, %s834_s17  }
  0x14   : > { %s601_s6 = sshll.u32 %s190_s5, 3  ;;  %s619_s7 = sshll.u32 %s842_s19, 7 }
  0x15   : > { %s1111_s30 = scalar_select %p937_p11, 1, 0 }
  0x16   : > { %s948_s10 = scalar_lea.hbm %s1102_s0, %s619_s7  ;;  %s194_s11 = scalar_lea.vmem [#allocation2], %s601_s6 }
  0x17   : > { %s204_s12 = sshll.u32 %s194_s11, 4  ;;  %p954_p0 = pnand %p639_p13, %p920_p4  ;;  %s950_s12 = int_to_ptr.vmem [resolvable:$true] %s204_s12 }
  0x18   : > { %s191_s14 = scalar_lea.sflag [#allocation3], %s190_s5  ;;  %s702_s21 = scalar_lea.hbm %s948_s10, 128 }
  0x19   : > { %p703_p3 = scmp.ne.s32.totalorder %s948_s10, %s702_s21  ;;  %p704_p5 = pneg %p954_p0 }
  0x1a   : > { %s707_s25 = scalar_lea.hbm %s1102_s0, 256  ;;  %p708_p4 = scmp.lt.u32.totalorder %s948_s10, %s1102_s0 }
  0x1b   : > { %p705_p6 = pnand %p704_p5, %p703_p3  ;;  %p709_p10 = scmp.lt.u32.totalorder %s707_s25, %s702_s21 }
  0x1c   : > { %p711_p12 = scmp.lt.u32.totalorder %s702_s21, %s948_s10 }
  0x1d   : > { %p706_p7 = pneg %p705_p6  ;;  %p710_p13 = por %p709_p10, %p708_p4 }
  0x1f   : > { %p712_p1 = por %p711_p12, %p710_p13 }
  0x21   : > { %p713_p2 = pnand %p712_p1, %p706_p7 }
  0x23   : > { %716 = shalt.err (!%p713_p2)
}
  0x24   : > { %s717_s5 = scalar_lea.vmem %s950_s12, 128  ;;  %s848_s7 = smov [#allocation2]  }
  0x25   : > { %p718_p3 = scmp.ne.s32.totalorder %s950_s12, %s717_s5  ;;  %s722_s8 = sshll.u32 %s848_s7, 4  ;;  %s723_s8 = int_to_ptr.vmem [resolvable:$false] %s722_s8 }
  0x26   : > { %s724_s9 = scalar_lea.vmem %s723_s8, 256  ;;  %p725_p9 = scmp.lt.s32.totalorder %s950_s12, %s723_s8 }
  0x27   : > { %p720_p6 = pnand %p718_p3, %p704_p5  ;;  %p726_p4 = scmp.lt.s32.totalorder %s724_s9, %s717_s5 }
  0x29   : > { %p721_p11 = pneg %p720_p6  ;;  %p727_p10 = por %p726_p4, %p725_p9 }
  0x2b   : > { %p728_p12 = pnand %p727_p10, %p721_p11 }
  0x2d   : > { %731 = shalt.err (!%p728_p12)
}
  0x2e   : > { %631 = dma.hbm_to_vmem [thread:$0]  (!%p954_p0), %s948_s10, 128, %s950_s12, %s191_s14  }
  0x2f   : > { %p1113_p1 = scmp.lt.s32.totalorder %s846_s20, 3  ;;  %p1114_p2 = scmp.ge.s32.totalorder %s846_s20, 1 }
  0x31   : > { %p222_p5 = pnand %p1114_p2, %p1113_p1 }
  0x32   : > { %s990_s11 = sand.u32 (!%p222_p5), 1, %s830_s16  }
  0x33   : > { %225 = sbr.rel (%p222_p5) target bundleno = 228 (0xe4), region = 32  ;;  %s605_s21 = sshll.u32 (!%p222_p5), %s990_s11, 3 }
  0x34   : > { %s228_s22 = scalar_lea.sflag (!%p222_p5), [#allocation3], %s990_s11  ;;  %s231_s13 = scalar_lea.vmem (!%p222_p5), [#allocation2], %s605_s21 }
  0x3a   : > { %813 = dma.done.wait (%p926_p8), %s228_s22, 128  }
  0x3b   : > { %815 = vsyncadd (%p926_p8), %s228_s22, 4294967168  ;;  %v849_v0 = vmov 0   ;;  %vm285_vm0 = vcmask 1043456   ;;  %v376_v1 = vld [vmem:[%s1104_s2] sm:$0xf]  ;;  %s620_s27 = sshll.u32 %s838_s18, 7 }
  0x3c   : > { %692 = vset.pattern.permute.xlu0 %v849_v0  ;;  %v281_v2 = vld [vmem:[%s231_s13] sm:$0xff]  ;;  %s261_s14 = scalar_lea.vmem [#allocation5], %s605_s21  ;;  %s1013_s6 = scalar_lea.hbm %s1105_s3, %s620_s27 }
  0x3d   : > { %379 = vperm.xlu0 %692, %v376_v1   ;;  %v283_v3 = vcombine.high %v281_v2, %v281_v2  ;;  %v286_v4 = vsel %vm285_vm0, %v281_v2, -inf  ;;  %s447_s24 = sshll.u32 %s261_s14, 4  ;;  %s426_s5 = scalar_lea.sflag [#allocation4], %s990_s11  ;;  %s1015_s24 = int_to_ptr.vmem [resolvable:$true] %s447_s24 }
  0x3e   : > { %v287_v5 = vrot.slane %v286_v4, 4  ;;  %s732_s7 = scalar_lea.vmem %s1015_s24, 128  ;;  %p1115_p9 = scmp.ne.s32.totalorder %s1110_s28, 0 }
  0x3f   : > { %v293_v6 = vsel %vm285_vm0, %v283_v3, -inf  ;;  %p733_p8 = scmp.ne.s32.totalorder %s1015_s24, %s732_s7  ;;  %s850_s8 = smov [#allocation5]  }
  0x40   : > { %v288_v7 = vmax.f32 %v286_v4, %v287_v5  ;;  %v294_v8 = vrot.slane %v293_v6, 4  ;;  %s736_s9 = sshll.u32 %s850_s8, 4  ;;  %s737_s9 = int_to_ptr.vmem [resolvable:$false] %s736_s9 }
  0x41   : > { %p734_p11 = pnand %p733_p8, %p1115_p9  ;;  %s738_s21 = scalar_lea.vmem %s737_s9, 256 }
  0x42   : > { %v289_v9 = vrot.slane %v288_v7, 2  ;;  %v295_v10 = vmax.f32 %v293_v6, %v294_v8  ;;  %p739_p7 = scmp.lt.s32.totalorder %s1015_s24, %s737_s9  ;;  %p740_p13 = scmp.lt.s32.totalorder %s738_s21, %s732_s7 }
  0x43   : > { %p735_p0 = pneg %p734_p11 }
  0x44   : > { %v290_v11 = vmax.f32 %v288_v7, %v289_v9  ;;  %v296_v12 = vrot.slane %v295_v10, 2  ;;  %p741_p3 = por %p740_p13, %p739_p7 }
  0x46   : > { %v291_v13 = vrot.slane %v290_v11, 1  ;;  %v297_v14 = vmax.f32 %v295_v10, %v296_v12  ;;  %p742_p6 = pnand %p741_p3, %p735_p0 }
  0x48   : > { %v292_v15 = vmax.f32 %v290_v11, %v291_v13  ;;  %v298_v16 = vrot.slane %v297_v14, 1 }
  0x4a   : > { %v299_v17 = vmax.f32 %v297_v14, %v298_v16 }
  0x4c   : > { %v302_v18 = vcombine.low %v292_v15, %v299_v17 }
  0x4e   : > { %v304_v19 = vsub.f32 %v281_v2, %v302_v18 }
  0x50   : > { %v305_v20 = vmul.f32 1.442695, %v304_v19 }
  0x52   : > { %694 = vpow2.f32 %v305_v20 }
  0x5c   : > { %v695_v21 = vpop.eup %694 }
  0x5d   : > { %v308_v22 = vcombine.high %v695_v21, %v695_v21  ;;  %v310_v23 = vsel %vm285_vm0, %v695_v21, 0.0 }
  0x5e   : > { %v311_v24 = vrot.slane %v310_v23, 4 }
  0x5f   : > { %v317_v25 = vsel %vm285_vm0, %v308_v22, 0.0 }
  0x60   : > { %v312_v26 = vadd.f32 %v311_v24, %v310_v23  ;;  %v318_v27 = vrot.slane %v317_v25, 4 }
  0x62   : > { %v313_v28 = vrot.slane %v312_v26, 2  ;;  %v319_v29 = vadd.f32 %v318_v27, %v317_v25 }
  0x64   : > { %v314_v30 = vadd.f32 %v313_v28, %v312_v26  ;;  %v320_v31 = vrot.slane %v319_v29, 2 }
  0x66   : > { %v315_v32 = vrot.slane %v314_v30, 1  ;;  %v321_v33 = vadd.f32 %v320_v31, %v319_v29 }
  0x68   : > { %v316_v34 = vadd.f32 %v315_v32, %v314_v30  ;;  %v322_v35 = vrot.slane %v321_v33, 1 }
  0x6a   : > { %v323_v36 = vadd.f32 %v322_v35, %v321_v33  ;;  %696 = vlog2.f32 %v316_v34 }
  0x6c   : > { %v326_v37 = vcombine.low %v316_v34, %v323_v36  ;;  %698 = vlog2.f32 %v323_v36 }
  0x6e   : > { %700 = vrcp.f32 %v326_v37 }
  0x74   : > { %v697_v38 = vpop.eup %696 }
  0x75   : > { %v332_v39 = vmul.f32 0.6931472, %v697_v38 }
  0x76   : > { %v699_v40 = vpop.eup %698 }
  0x77   : > { %v334_v41 = vmul.f32 0.6931472, %v699_v40 }
  0x78   : > { %v701_v42 = vpop.eup %700 }
  0x79   : > { %v337_v43 = vcombine.low %v332_v39, %v334_v41  ;;  %v329_v44 = vmul.f32 %v701_v42, %v695_v21 }
  0x7b   : > { %v339_v45 = vsub.f32 %v304_v19, %v337_v43  ;;  %330 = vst [vmem:[%s261_s14] sm:$0xff] %v329_v44 }
  0x7c   : > { %745 = shalt.err (!%p742_p6)
}
  0x7d   : > { %s746_s22 = scalar_lea.hbm %s1013_s6, 128  ;;  %s750_s12 = scalar_lea.hbm %s1105_s3, 256 }
  0x7e   : > { %p747_p4 = scmp.ne.s32.totalorder %s1013_s6, %s746_s22  ;;  %p751_p1 = scmp.lt.u32.totalorder %s1013_s6, %s1105_s3 }
  0x7f   : > { %p752_p2 = scmp.lt.u32.totalorder %s750_s12, %s746_s22  ;;  %p754_p8 = scmp.lt.u32.totalorder %s746_s22, %s1013_s6 }
  0x80   : > { %p748_p10 = pnand %p747_p4, %p1115_p9 }
  0x81   : > { %p753_p5 = por %p752_p2, %p751_p1 }
  0x82   : > { %p749_p12 = pneg %p748_p10 }
  0x83   : > { %p755_p11 = por %p754_p8, %p753_p5 }
  0x85   : > { %p756_p0 = pnand %p755_p11, %p749_p12 }
  0x87   : > { %759 = shalt.err (!%p756_p0)
}
  0x88   : > { %624 = dma.vmem_to_hbm [thread:$0]  (%p1115_p9), %s1015_s24, 128, %s1013_s6, %s426_s5   ;;  %v341_v46 = vlaneseq  ;;  %v358_v53 = vcombine.high %v339_v45, %v339_v45  ;;  %v851_v54 = vmov 0.0   ;;  %v852_v16 = vmov 1966171168  }
  0x89   : > { %p271_p7 = scmp.lt.s32.totalorder %s838_s18, 1  ;;  %v406_v17 = vunpack.c.l.s4 %v852_v16  ;;  %s607_s24 = sshll.u32 %s990_s11, 1 }
  0x8a   : > { %v342_v47 = vshrl.u32 %v341_v46, 7  ;;  %s621_s6 = sshll.u32 %s838_s18, 5  ;;  %s268_s5 = scalar_lea.vmem [#allocation6], %s607_s24  ;;  %vm422_vm3 = vcmp.lt.s32.totalorder %v341_v46, 256 }
  0x8b   : > { %s272_s25 = scalar_select %p271_p7, %s838_s18, 1  ;;  %v407_v24 = vunpack.c.0.s8 %v406_v17 }
  0x8c   : > { %v345_v48 = vsub.s32 0, %v342_v47  ;;  %v349_v49 = vsub.s32 1, %v342_v47  ;;  %s463_s21 = sshll.u32 %s268_s5, 4  ;;  %s1053_s10 = scalar_lea.hbm %s1106_s4, %s621_s6  ;;  %s1055_s21 = int_to_ptr.vmem [resolvable:$true] %s463_s21 }
  0x8d   : > { %s608_s26 = sshll.u32 %s272_s25, 1  ;;  %v410_v31 = vsub.s32 %v407_v24, %v342_v47  ;;  %s431_s12 = scalar_lea.sflag [#allocation7], %s990_s11 }
  0x8e   : > { %s277_s9 = scalar_lea.vmem %s1103_s1, %s608_s26  ;;  %s760_s27 = scalar_lea.vmem %s1055_s21, 32 }
  0x8f   : > { %v340_v50 = vld [vmem:[%s277_s9] sm:$0x3]  ;;  %p761_p13 = scmp.ne.s32.totalorder %s1055_s21, %s760_s27  ;;  %s853_s18 = smov [#allocation6]  }
  0x90   : > { %v346_v51 = vrot.slane %v340_v50, %v345_v48  ;;  %v350_v52 = vrot.slane %v340_v50, %v349_v49  ;;  %s764_s14 = sshll.u32 %s853_s18, 4  ;;  %s765_s14 = int_to_ptr.vmem [resolvable:$false] %s764_s14 }
  0x91   : > { %p762_p3 = pnand %p761_p13, %p1115_p9  ;;  %s766_s25 = scalar_lea.vmem %s765_s14, 64 }
  0x92   : > { %vm351_vm1 = vcmp.eq.s32.totalorder %v342_v47, %v346_v51  ;;  %vm352_vm2 = vcmp.eq.s32.totalorder %v342_v47, %v350_v52  ;;  %p767_p4 = scmp.lt.s32.totalorder %s1055_s21, %s765_s14  ;;  %p768_p10 = scmp.lt.s32.totalorder %s766_s25, %s760_s27 }
  0x93   : > { %v609_v55 = vsel %vm351_vm1, 1.0, %v851_v54  ;;  %v610_v56 = vsel %vm352_vm2, 1.0, %v851_v54  ;;  %p763_p6 = pneg %p762_p3 }
  0x94   : > { %v360_v57 = vmul.f32 %v609_v55, %v339_v45  ;;  %v361_v58 = vmul.f32 %v610_v56, %v358_v53  ;;  %p769_p12 = por %p768_p10, %p767_p4 }
  0x96   : > { %v362_v59 = vsel %vm285_vm0, %v360_v57, 0.0  ;;  %v369_v60 = vsel %vm285_vm0, %v361_v58, 0.0  ;;  %p770_p1 = pnand %p769_p12, %p763_p6 }
  0x97   : > { %v363_v61 = vrot.slane %v362_v59, 4  ;;  %v370_v62 = vrot.slane %v369_v60, 4 }
  0x99   : > { %v364_v63 = vadd.f32 %v363_v61, %v362_v59  ;;  %v371_v0 = vadd.f32 %v370_v62, %v369_v60 }
  0x9b   : > { %v365_v4 = vrot.slane %v364_v63, 2  ;;  %v372_v5 = vrot.slane %v371_v0, 2 }
  0x9d   : > { %v366_v10 = vadd.f32 %v365_v4, %v364_v63  ;;  %v373_v11 = vadd.f32 %v372_v5, %v371_v0 }
  0x9f   : > { %v367_v18 = vrot.slane %v366_v10, 1  ;;  %v374_v19 = vrot.slane %v373_v11, 1 }
  0xa1   : > { %v368_v25 = vadd.f32 %v367_v18, %v366_v10  ;;  %v375_v26 = vadd.f32 %v374_v19, %v373_v11 }
  0xbc   : > { %v380_v1 = vpop.permute.xlu0 %379 }
  0xbd   : > { %v382_v2 = vmul.f32 %v609_v55, %v380_v1  ;;  %v383_v3 = vmul.f32 %v610_v56, %v380_v1 }
  0xbf   : > { %v384_v6 = vsel %vm285_vm0, %v382_v2, 0.0  ;;  %v391_v7 = vsel %vm285_vm0, %v383_v3, 0.0 }
  0xc0   : > { %v385_v8 = vrot.slane %v384_v6, 4  ;;  %v392_v9 = vrot.slane %v391_v7, 4 }
  0xc2   : > { %v386_v12 = vadd.f32 %v385_v8, %v384_v6  ;;  %v393_v13 = vadd.f32 %v392_v9, %v391_v7 }
  0xc4   : > { %v387_v14 = vrot.slane %v386_v12, 2  ;;  %v394_v15 = vrot.slane %v393_v13, 2 }
  0xc6   : > { %v388_v20 = vadd.f32 %v387_v14, %v386_v12  ;;  %v395_v21 = vadd.f32 %v394_v15, %v393_v13 }
  0xc8   : > { %v389_v22 = vrot.slane %v388_v20, 1  ;;  %v396_v23 = vrot.slane %v395_v21, 1 }
  0xca   : > { %v390_v27 = vadd.f32 %v389_v22, %v388_v20  ;;  %v397_v28 = vadd.f32 %v396_v23, %v395_v21 }
  0xcc   : > { %v398_v29 = vsub.f32 0.0, %v390_v27  ;;  %v399_v30 = vsub.f32 0.0, %v397_v28 }
  0xce   : > { %v400_v32 = vmul.f32 %v398_v29, %v368_v25  ;;  %v401_v33 = vmul.f32 %v399_v30, %v375_v26 }
  0xd0   : > { %v404_v34 = vcombine.low %v400_v32, %v401_v33 }
  0xd2   : > { %v411_v35 = vrot.slane %v404_v34, %v410_v31 }
  0xd4   : > { %v418_v36 = vrot.slane %v411_v35, %v410_v31 }
  0xd6   : > { %424 = vst.msk [vmem:[%s268_s5] sm:$0x3] %vm422_vm3, %v418_v36 }
  0xd7   : > { %773 = shalt.err (!%p770_p1)
}
  0xd8   : > { %s774_s11 = scalar_lea.hbm %s1053_s10, 32  ;;  %s778_s8 = scalar_lea.hbm %s1106_s4, 64 }
  0xd9   : > { %p775_p2 = scmp.ne.s32.totalorder %s1053_s10, %s774_s11  ;;  %p779_p11 = scmp.lt.u32.totalorder %s1053_s10, %s1106_s4 }
  0xda   : > { %p780_p0 = scmp.lt.u32.totalorder %s778_s8, %s774_s11  ;;  %p782_p13 = scmp.lt.u32.totalorder %s774_s11, %s1053_s10 }
  0xdb   : > { %p776_p5 = pnand %p775_p2, %p1115_p9 }
  0xdc   : > { %p781_p7 = por %p780_p0, %p779_p11 }
  0xdd   : > { %p777_p8 = pneg %p776_p5 }
  0xde   : > { %p783_p3 = por %p782_p13, %p781_p7 }
  0xe0   : > { %p784_p6 = pnand %p783_p3, %p777_p8 }
  0xe2   : > { %787 = shalt.err (!%p784_p6)
}
  0xe3   : > { %625 = dma.vmem_to_hbm [thread:$0]  (%p1115_p9), %s1055_s21, 32, %s1053_s10, %s431_s12  }
  0xe4 PF: > { %s475_s6 = sand.u32 1, %s826_s15   ;;  %p1116_p4 = scmp.ne.s32.totalorder %s1111_s30, 0 }
  0xe5   : > { %p1117_p10 = scmp.ge.s32.totalorder %s846_s20, 2  ;;  %s476_s5 = scalar_lea.sflag [#allocation4], %s475_s6 }
  0xe7   : > { %p633_p12 = pnand %p1117_p10, %p1116_p4 }
  0xe9   : > { %817 = dma.done.wait (!%p633_p12), %s476_s5, 128  }
  0xea   : > { %819 = vsyncadd (!%p633_p12), %s476_s5, 4294967168  ;;  %s485_s22 = scalar_lea.sflag [#allocation7], %s475_s6 }
  0xeb   : > { %821 = dma.done.wait (!%p633_p12), %s485_s22, 32  }
  0xec   : > { %823 = vsyncadd (!%p633_p12), %s485_s22, 4294967264  ;;  %s24_s20 = sadd.s32 1, %s846_s20   ;;  %s1118_s15 = smov %s830_s16 }
  0xed   : > { %p21_p1 = scmp.ge.s32.totalorder %s24_s20, 4   ;;  %s1119_s16 = smov %s834_s17 }
  0xee   : > { %s1120_s17 = smov %s935_s29  ;;  %s1121_s18 = smov %s842_s19 }
  0xef   : > { %s1122_s19 = smov %s1124_s23  ;;  %23 = sbr.rel (!%p21_p1) target bundleno = 8 (0x8), region = 97 }
  0xf6   :  { %490 = vsyncpa [#allocation3], 1 }
  0xf7   :  { %492 = vsyncpa [#allocation3 + $0x1], 1 }
  0xf8   :  { %493 = vsyncpa [#allocation4], 1 }
  0xf9   :  { %495 = vsyncpa [#allocation4 + $0x1], 1 }
  0xfa   :  { %496 = vsyncpa [#allocation7], 1 }
  0xfb   :  { %498 = vsyncpa [#allocation7 + $0x1], 1 }

</bundles_post_ra>
